<compile_context>
chip_gen: v7x
topology: tpu7x:2x2x1
jax: 0.10.0
libtpu: 0.0.40
codegen_flags: <defaults>
</compile_context>

<pallas_src>
import functools

import jax
import jax.numpy as jnp
from jax.experimental import pallas as pl
from jax.experimental.pallas import tpu as pltpu

_LANE = 128
_SUBLANE = 8


def _round_up(v, m):
    return ((v + m - 1) // m) * m


def _khatri_rao_3(f1, f2, f3):
    """(m1,R),(m2,R),(m3,R) -> (m1*m2*m3, R), row-major over (i,j,k).
    Tiny parameter-only glue (O(M*R)); independent of the activations."""
    m1 = f1.shape[0]
    m2 = f2.shape[0]
    m3 = f3.shape[0]
    g = jnp.einsum('ir,jr,kr->ijkr', f1, f2, f3)
    return g.reshape(m1 * m2 * m3, f1.shape[1])


def _vmem_limit(buf_bytes):
    # Allow big tiles on v5e/v6e but stay comfortably under v7x's 64 MiB/TC.
    return int(min(56 * 1024 * 1024, max(32 * 1024 * 1024, 2 * buf_bytes)))


# ----------------------------------------------------------------------------
# Folded path (C_pad <= 128): out = x_flat @ W + bias, W = khatri_rao @ proj.
# Output block (f32, lane-dense) doubles as the accumulator across the K axis.
# ----------------------------------------------------------------------------
def _folded_kernel(x_ref, w_ref, b_ref, o_ref, *, tk, w_resident):
    # x_ref: (tb, tk) bf16 tile
    # w_ref: (M_pad, C_pad) resident  OR  (tk, C_pad) streamed
    # b_ref: (1,) f32 bias in SMEM
    # o_ref: (tb, C_pad) f32, resident across the reduction axis
    k = pl.program_id(1)

    @pl.when(k == 0)
    def _():
        o_ref[...] = jnp.zeros_like(o_ref) + b_ref[0]

    if w_resident:
        w_blk = w_ref[pl.ds(pl.multiple_of(k * tk, tk), tk), :]
    else:
        w_blk = w_ref[...]
    o_ref[...] += jnp.dot(x_ref[...], w_blk, preferred_element_type=jnp.float32)


# ----------------------------------------------------------------------------
# Factored path (C_pad > 128): t = x_flat @ g (R_pad lanes), out = t @ proj + b.
# ----------------------------------------------------------------------------
def _factored_kernel(x_ref, g_ref, p_ref, b_ref, o_ref, acc_ref, *, tk, g_resident):
    # x_ref: (tb, tk) bf16; g_ref: (M_pad, R_pad) resident OR (tk, R_pad) streamed
    # p_ref: (R_pad, C_pad) f32, resident; b_ref: (1,) SMEM
    # o_ref: (tb, C_pad) f32; acc_ref: (tb, R_pad) f32 scratch
    k = pl.program_id(1)

    @pl.when(k == 0)
    def _():
        acc_ref[...] = jnp.zeros_like(acc_ref)

    if g_resident:
        g_blk = g_ref[pl.ds(pl.multiple_of(k * tk, tk), tk), :]
    else:
        g_blk = g_ref[...]
    acc_ref[...] += jnp.dot(x_ref[...], g_blk, preferred_element_type=jnp.float32)

    @pl.when(k == pl.num_programs(1) - 1)
    def _():
        o_ref[...] = (jnp.dot(acc_ref[...], p_ref[...],
                              preferred_element_type=jnp.float32)
                      + b_ref[0]).astype(o_ref.dtype)


def cp_trl_forward(x, weight, factors, bias, *,
                   tk_max=2048, tb_max=256,
                   stream_dtype=jnp.bfloat16,
                   weight_resident_bytes=8 * 1024 * 1024):
    """CP tensor regression forward: x (B,m1,m2,m3) -> (B, C)."""
    B = int(x.shape[0])
    m1, m2, m3 = int(x.shape[1]), int(x.shape[2]), int(x.shape[3])
    M = m1 * m2 * m3
    f1, f2, f3, f4 = factors
    R = int(f4.shape[1])
    C = int(f4.shape[0])
    C_pad = _round_up(C, _LANE)
    f32 = jnp.float32
    xb = jnp.dtype(stream_dtype).itemsize

    # ---- batch tiling: 8-aligned tiles; keep >= 2 tiles once B >= 16 so the
    # "parallel" batch axis can shard across v7x's two TensorCores. ----
    if B <= _SUBLANE:
        tb = B                                    # block == full dim (layout-legal)
    else:
        tb = min(_round_up(B, _SUBLANE), _round_up(tb_max, _SUBLANE))
        if B >= 16:
            tb = min(tb, _round_up((B + 1) // 2, _SUBLANE))
    B_pad = _round_up(B, tb)
    nb = B_pad // tb

    # ---- reduction tiling: 128-aligned tk, M zero-padded to a tk multiple so the
    # last K tile never accumulates uninitialized data. ----
    tk = min(_round_up(M, _LANE), _round_up(tk_max, _LANE))
    M_pad = _round_up(M, tk)
    nk = M_pad // tk

    # Factored CP weights (never materialize the (m1,m2,m3,C) tensor beyond (M,C)).
    g = _khatri_rao_3(f1.astype(f32), f2.astype(f32), f3.astype(f32))     # (M, R)
    proj = weight.astype(f32)[:, None] * f4.T.astype(f32)                 # (R, C)

    x_flat = jnp.pad(x.reshape(B, M),
                     ((0, B_pad - B), (0, M_pad - M))).astype(stream_dtype)
    bias_arr = bias.reshape((1,)).astype(f32)

    if C_pad <= _LANE:
        # ------------------ folded single-matmul path ------------------
        w_full = jnp.pad(g @ proj,
                         ((0, M_pad - M), (0, C_pad - C))).astype(stream_dtype)
        w_resident = (M_pad * C_pad * xb) <= weight_resident_bytes
        if w_resident:
            w_spec = pl.BlockSpec((M_pad, C_pad), lambda i, k: (0, 0))
            w_buf = M_pad * C_pad * xb
        else:
            w_spec = pl.BlockSpec((tk, C_pad), lambda i, k: (k, 0))
            w_buf = 2 * tk * C_pad * xb
        buf_bytes = 2 * tb * tk * xb + 2 * w_buf + 2 * tb * C_pad * 4

        cost = pl.CostEstimate(
            flops=2 * B_pad * M_pad * C_pad,
            transcendentals=0,
            bytes_accessed=(B_pad * M_pad * xb
                            + (1 if w_resident else nb) * M_pad * C_pad * xb
                            + B_pad * C_pad * 4 + 4))

        out = pl.pallas_call(
            functools.partial(_folded_kernel, tk=tk, w_resident=w_resident),
            out_shape=jax.ShapeDtypeStruct((B_pad, C_pad), f32),
            grid_spec=pltpu.PrefetchScalarGridSpec(
                num_scalar_prefetch=0,
                grid=(nb, nk),                                  # reduction axis last
                in_specs=[
                    pl.BlockSpec((tb, tk), lambda i, k: (i, k)),      # x tile
                    w_spec,                                           # folded W
                    pl.BlockSpec(memory_space=pltpu.SMEM),            # bias
                ],
                out_specs=pl.BlockSpec((tb, C_pad), lambda i, k: (i, 0)),
            ),
            compiler_params=pltpu.CompilerParams(
                dimension_semantics=("parallel", "arbitrary"),
                vmem_limit_bytes=_vmem_limit(buf_bytes)),
            cost_estimate=cost,
        )(x_flat, w_full, bias_arr)
    else:
        # ------------------ factored two-matmul path (C_pad > 128) ------------------
        R_pad = _round_up(R, _LANE)                      # lane-dense rank dimension
        g_pad = jnp.pad(g, ((0, M_pad - M), (0, R_pad - R))).astype(stream_dtype)
        proj_pad = jnp.pad(proj, ((0, R_pad - R), (0, C_pad - C))).astype(f32)
        g_resident = (M_pad * R_pad * xb) <= weight_resident_bytes
        if g_resident:
            g_spec = pl.BlockSpec((M_pad, R_pad), lambda i, k: (0, 0))
            g_buf = M_pad * R_pad * xb
        else:
            g_spec = pl.BlockSpec((tk, R_pad), lambda i, k: (k, 0))
            g_buf = 2 * tk * R_pad * xb
        buf_bytes = (2 * tb * tk * xb + 2 * g_buf + R_pad * C_pad * 4
                     + tb * R_pad * 4 + 2 * tb * C_pad * 4)

        cost = pl.CostEstimate(
            flops=2 * B_pad * M_pad * R_pad + 2 * B_pad * R_pad * C_pad,
            transcendentals=0,
            bytes_accessed=(B_pad * M_pad * xb
                            + (1 if g_resident else nb) * M_pad * R_pad * xb
                            + R_pad * C_pad * 4 + B_pad * C_pad * 4 + 4))

        out = pl.pallas_call(
            functools.partial(_factored_kernel, tk=tk, g_resident=g_resident),
            out_shape=jax.ShapeDtypeStruct((B_pad, C_pad), f32),
            grid_spec=pltpu.PrefetchScalarGridSpec(
                num_scalar_prefetch=0,
                grid=(nb, nk),
                in_specs=[
                    pl.BlockSpec((tb, tk), lambda i, k: (i, k)),          # x tile
                    g_spec,                                               # khatri-rao
                    pl.BlockSpec((R_pad, C_pad), lambda i, k: (0, 0)),    # weight*f4^T
                    pl.BlockSpec(memory_space=pltpu.SMEM),                # bias
                ],
                out_specs=pl.BlockSpec((tb, C_pad), lambda i, k: (i, 0)),
                scratch_shapes=[pltpu.VMEM((tb, R_pad), f32)],
            ),
            compiler_params=pltpu.CompilerParams(
                dimension_semantics=("parallel", "arbitrary"),
                vmem_limit_bytes=_vmem_limit(buf_bytes)),
            cost_estimate=cost,
        )(x_flat, g_pad, proj_pad, bias_arr)

    return out[:B, :C]                                   # drop batch / lane padding


if __name__ == "__main__":
    def reference(x, weight, factors, bias):
        # Plain-JAX reference: full CP reconstruction + generalized inner product.
        w_full = jnp.einsum('r,ir,jr,kr,cr->ijkc', weight, *factors)
        return jnp.einsum('bijk,ijkc->bc', x, w_full) + bias[0]

    def make_case(key, B, m1, m2, m3, C, R):
        ks = jax.random.split(key, 5)
        x = jax.random.normal(ks[0], (B, m1, m2, m3), dtype=jnp.float32)
        # Parameters exactly as CP_TRL.__init__: bias=zeros(1), weight=ones(rank),
        # factors ~ U(-0.1, 0.1).
        bias = jnp.zeros((1,), dtype=jnp.float32)
        weight = jnp.ones((R,), dtype=jnp.float32)
        factors = [
            jax.random.uniform(ks[1], (m1, R), minval=-0.1, maxval=0.1, dtype=jnp.float32),
            jax.random.uniform(ks[2], (m2, R), minval=-0.1, maxval=0.1, dtype=jnp.float32),
            jax.random.uniform(ks[3], (m3, R), minval=-0.1, maxval=0.1, dtype=jnp.float32),
            jax.random.uniform(ks[4], (C, R), minval=-0.1, maxval=0.1, dtype=jnp.float32),
        ]
        return x, weight, factors, bias

    key = jax.random.PRNGKey(0)
    keys = jax.random.split(key, 6)

    cases = [
        # (shape dict, wrapper kwargs): cover folded/factored paths, resident vs
        # streamed weights, multi-tile reduction/batch, and M/B zero-padding.
        (dict(B=2,  m1=4, m2=8,  m3=8,  C=16,  R=8), {}),
        (dict(B=2,  m1=4, m2=8,  m3=8,  C=160, R=8), {}),
        (dict(B=24, m1=4, m2=10, m3=10, C=16,  R=8),
         dict(tk_max=256, weight_resident_bytes=0)),
        (dict(B=24, m1=4, m2=10, m3=10, C=200, R=8),
         dict(tk_max=256, weight_resident_bytes=0)),
        (dict(B=2,  m1=4, m2=10, m3=10, C=16,  R=8), dict(tk_max=256)),
        (dict(B=2,  m1=4, m2=10, m3=10, C=160, R=8), dict(tk_max=256)),
    ]

    for idx, (shp, kw) in enumerate(cases):
        x, weight, factors, bias = make_case(
            keys[idx], shp["B"], shp["m1"], shp["m2"], shp["m3"], shp["C"], shp["R"])
        out = jax.block_until_ready(cp_trl_forward(x, weight, factors, bias, **kw))
        ref = reference(x, weight, factors, bias)
        assert out.shape == ref.shape == (shp["B"], shp["C"])
        # Operands are streamed in bf16 (per perf review); tolerance set accordingly.
        max_err = float(jnp.max(jnp.abs(out - ref)))
        assert jnp.allclose(out, ref, atol=3e-4, rtol=2e-2), \
            f"case {idx}: Pallas kernel mismatch vs reference (max abs err {max_err})"

    print("KERNEL_OK")
</pallas_src>

<mosaic_0001>
module attributes {stable_mosaic.version = 11 : i64} {
  func.func @_folded_kernel(%arg0: i32, %arg1: i32, %arg2: memref<2x256xbf16, #tpu.memory_space<vmem>>, %arg3: memref<256x128xbf16, #tpu.memory_space<vmem>>, %arg4: memref<1xf32, #tpu.memory_space<smem>>, %arg5: memref<2x128xf32, #tpu.memory_space<vmem>>) attributes {dimension_semantics = [#tpu.dimension_semantics<parallel>, #tpu.dimension_semantics<arbitrary>], iteration_bounds = array<i64: 1, 1>, scalar_prefetch = 0 : i64, scratch_operands = 0 : i64, tpu.core_type = #tpu.core_type<tc>, window_params = [{transform_indices = @transform_0, window_bounds = array<i64: 2, 256>}, {pipeline_mode = #tpu.pipeline_mode<synchronous>, transform_indices = @transform_1, window_bounds = array<i64: 256, 128>}, {transform_indices = @transform_2, window_bounds = array<i64: 1>}, {transform_indices = @transform_3, window_bounds = array<i64: 2, 128>}]} {
    %c0_i32 = arith.constant 0 : i32
    %0 = arith.cmpi eq, %arg1, %c0_i32 : i32
    %1 = arith.extui %0 : i1 to i32
    %c0_i32_0 = arith.constant 0 : i32
    %2 = arith.cmpi ne, %1, %c0_i32_0 : i32
    scf.if %2 {
      %cst_7 = arith.constant 0.000000e+00 : f32
      %12 = vector.broadcast %cst_7 : f32 to vector<2x128xf32>
      %c0_8 = arith.constant 0 : index
      %13 = memref.load %arg4[%c0_8] : memref<1xf32, #tpu.memory_space<smem>>
      %14 = vector.broadcast %13 : f32 to vector<2x128xf32>
      %15 = arith.addf %12, %14 : vector<2x128xf32>
      %c0_9 = arith.constant 0 : index
      %c0_10 = arith.constant 0 : index
      %16 = vector.load %arg5[%c0_9, %c0_10] : memref<2x128xf32, #tpu.memory_space<vmem>>, vector<2x128xf32>
      tpu.vector_store %arg5[%c0_9, %c0_10], %15 {strides = array<i32>} : memref<2x128xf32, #tpu.memory_space<vmem>>, vector<2x128xf32>,
    } else {
    }
    %c256_i32 = arith.constant 256 : i32
    %3 = arith.muli %arg1, %c256_i32 : i32
    %4 = tpu.assume_multiple %3, 256 : i32
    %5 = arith.index_cast %4 : i32 to index
    %c0 = arith.constant 0 : index
    %6 = vector.load %arg3[%5, %c0] : memref<256x128xbf16, #tpu.memory_space<vmem>>, vector<256x128xbf16>
    %c0_1 = arith.constant 0 : index
    %c0_2 = arith.constant 0 : index
    %7 = vector.load %arg5[%c0_1, %c0_2] : memref<2x128xf32, #tpu.memory_space<vmem>>, vector<2x128xf32>
    %c0_3 = arith.constant 0 : index
    %c0_4 = arith.constant 0 : index
    %8 = vector.load %arg2[%c0_3, %c0_4] : memref<2x256xbf16, #tpu.memory_space<vmem>>, vector<2x256xbf16>
    %cst = arith.constant dense<0.000000e+00> : vector<2x128xf32>
    %9 = tpu.matmul %8, %6, %cst {dimension_numbers = #tpu.dot_dimension_numbers<[1], [0], [0], [1], [0, 0, 1, 1], [], []>} : vector<2x256xbf16>, vector<256x128xbf16>, vector<2x128xf32> -> vector<2x128xf32>
    %10 = arith.addf %7, %9 : vector<2x128xf32>
    %c0_5 = arith.constant 0 : index
    %c0_6 = arith.constant 0 : index
    %11 = vector.load %arg5[%c0_5, %c0_6] : memref<2x128xf32, #tpu.memory_space<vmem>>, vector<2x128xf32>
    tpu.vector_store %arg5[%c0_5, %c0_6], %10 {strides = array<i32>} : memref<2x128xf32, #tpu.memory_space<vmem>>, vector<2x128xf32>,
    return
  }
  func.func @transform_0(%arg0: i32, %arg1: i32) -> (i32, i32) {
    %c0_i32 = arith.constant 0 : i32
    return %arg0, %arg1 : i32, i32
  }
  func.func @transform_1(%arg0: i32, %arg1: i32) -> (i32, i32) {
    %c0_i32 = arith.constant 0 : i32
    %c0_i32_0 = arith.constant 0 : i32
    %c0_i32_1 = arith.constant 0 : i32
    return %c0_i32, %c0_i32_0 : i32, i32
  }
  func.func @transform_2(%arg0: i32, %arg1: i32) -> i32 {
    %c0_i32 = arith.constant 0 : i32
    %c0_i32_0 = arith.constant 0 : i32
    return %c0_i32 : i32
  }
  func.func @transform_3(%arg0: i32, %arg1: i32) -> (i32, i32) {
    %c0_i32 = arith.constant 0 : i32
    %c0_i32_0 = arith.constant 0 : i32
    return %arg0, %c0_i32 : i32, i32
  }
}

</mosaic_0001>

<bundles_post_ra>
// kernel: tpu_custom_call.1
= control target key start
LH: loop header
LB: loop body
LE: loop exit
PB: predicated region body
PF: predicated region fallthrough
CT: control target
= control target key end

     0   :  { %9 = vsyncpa [#allocation4], 0  ;;  %s421_s0 = inlined_call_operand.vmem [shape: bf16[2,256], index: 0, kind: input, shape index: {}]   ;;  %s422_s1 = inlined_call_operand.hbm [shape: bf16[256,128], index: 1, kind: input, shape index: {}]   ;;  %s423_s2 = inlined_call_operand.<no memory space> [shape: f32[1], index: 2, kind: input, shape index: {}]   ;;  %s424_s3 = inlined_call_operand.hbm [shape: f32[2,128], index: 3, kind: output, shape index: {}]  }
   0x1   :  { %10 = vsyncpa [#allocation5], 0  ;;  %s366_s12 = smov [#allocation3]   ;;  %s318_s16 = scalar_lea.hbm %s422_s1, 2048 }
   0x2   :  { %s18_s13 = sshll.u32 %s366_s12, 4  ;;  %p319_p0 = scmp.ne.s32.totalorder %s422_s1, %s318_s16  ;;  %s19_s13 = int_to_ptr.vmem [resolvable:$true] %s18_s13 }
   0x3   :  { %p322_p1 = scmp.lt.u32.totalorder %s318_s16, %s422_s1 }
   0x5   :  { %p324_p2 = pnand %p322_p1, %p319_p0 }
   0x7   :  { %327 = shalt.err (!%p324_p2)
}
   0x8   :  { %s328_s21 = scalar_lea.vmem %s19_s13, 2048  ;;  %p333_p4 = scmp.lt.s32.totalorder %s19_s13, %s19_s13 }
   0x9   :  { %p329_p3 = scmp.ne.s32.totalorder %s19_s13, %s328_s21  ;;  %p334_p5 = scmp.lt.s32.totalorder %s328_s21, %s328_s21 }
   0xb   :  { %p335_p6 = por %p334_p5, %p333_p4 }
   0xd   :  { %p336_p7 = pnand %p335_p6, %p329_p3 }
   0xf   :  { %339 = shalt.err (!%p336_p7)
}
  0x10   :  { %s367_s22 = smov 64   ;;  %s368_s23 = smov 4  }
  0x11   :  { %24 = dma.hbm_to_vmem [thread:$0]  %s422_s1, 2048, %s19_s13, [#allocation4], %s367_s22, %s367_s22, %s368_s23  }
  0x12   :  { %362 = dma.done.wait [#allocation4], 2048  }
  0x13   :  { %363 = vsyncadd [#allocation4], 4294965248  ;;  %v302_v0 = vld [vmem:[#allocation3 + $0x40] sm:$0xff]   ;;  %v304_v2 = vld [vmem:[#allocation3 + $0x48] sm:$0xff]   ;;  %v369_v6 = vmov 1966171168   ;;  %v90_v8 = vlaneseq  ;;  %v36_v26 = vstv %s423_s2 }
  0x14   :  { %v303_v1 = vld [vmem:[#allocation3] sm:$0xff]   ;;  %275 = vmatprep.subr.bf16.mxu0 %v302_v0  ;;  %v305_v3 = vld [vmem:[#allocation3 + $0x8] sm:$0xff]   ;;  %v306_v4 = vld [vmem:[#allocation3 + $0x50] sm:$0xff]   ;;  %v88_v7 = vunpack.c.l.s4 %v369_v6  ;;  %38 = vst [vmem:[#allocation6] sm:$0x3] %v36_v26 }
  0x15   :  { %276 = vmatpush3.bf16.msra.mxu0 %v303_v1  ;;  %v307_v5 = vld [vmem:[#allocation3 + $0x10] sm:$0xff]   ;;  %v308_v9 = vld [vmem:[#allocation3 + $0x58] sm:$0xff]   ;;  %v91_v12 = vshrl.u32 %v90_v8, 7  ;;  %v310_v13 = vld [vmem:[#allocation3 + $0x60] sm:$0xff]  }
  0x16   :  { %277 = vmatprep.subr.bf16.mxu0 %v304_v2  ;;  %v309_v10 = vld [vmem:[#allocation3 + $0x18] sm:$0xff]   ;;  %v89_v11 = vunpack.c.0.s8 %v88_v7  ;;  %v311_v14 = vld [vmem:[#allocation3 + $0x20] sm:$0xff]   ;;  %v312_v16 = vld [vmem:[#allocation3 + $0x68] sm:$0xff]  }
  0x17   :  { %v258_v17 = vld.sshfl [vmem:[%s421_s0] sm:$0x11 pattern:$0x75316420]  ;;  %v313_v19 = vld [vmem:[#allocation3 + $0x28] sm:$0xff]   ;;  %v314_v21 = vld [vmem:[#allocation3 + $0x70] sm:$0xff]  }
  0x18   :  { %v92_v15 = vsub.s32 %v89_v11, %v91_v12  ;;  %v86_v18 = vcombine.high %v258_v17, %v258_v17  ;;  %v315_v22 = vld [vmem:[#allocation3 + $0x30] sm:$0xff]   ;;  %v316_v23 = vld [vmem:[#allocation3 + $0x78] sm:$0xff]   ;;  %s370_s0 = smov [#allocation6]  }
  0x19   :  { %278 = vmatpush3.bf16.msra.mxu0 %v305_v3  ;;  %v317_v24 = vld [vmem:[#allocation3 + $0x38] sm:$0xff]   ;;  %s247_s29 = sshll.u32 %s370_s0, 4  ;;  %s248_s29 = int_to_ptr.vmem [resolvable:$true] %s247_s29 }
  0x1a   :  { %279 = vmatprep.subr.bf16.mxu0 %v306_v4  ;;  %v100_v20 = vrot.slane %v86_v18, %v92_v15  ;;  %v93_v25 = vrot.slane %v258_v17, %v92_v15  ;;  %s340_s30 = scalar_lea.vmem %s248_s29, 32  ;;  %p345_p9 = scmp.lt.s32.totalorder %s248_s29, %s248_s29 }
  0x1b   :  { %v76_v28 = vld [vmem:[#allocation6] sm:$0x3]  ;;  %p341_p8 = scmp.ne.s32.totalorder %s248_s29, %s340_s30  ;;  %p346_p10 = scmp.lt.s32.totalorder %s340_s30, %s340_s30 }
  0x1c   :  { %231 = vmatprep.mubr.bf16.mxu0 %v100_v20 }
  0x1d   :  { %280 = vmatpush3.bf16.msra.mxu0 %v307_v5  ;;  %p347_p11 = por %p346_p10, %p345_p9 }
  0x1e   :  { %281 = vmatprep.subr.bf16.mxu0 %v308_v9 }
  0x1f   :  { %p348_p12 = pnand %p347_p11, %p341_p8 }
  0x21   :  { %282 = vmatpush3.bf16.msra.mxu0 %v309_v10 }
  0x22   :  { %283 = vmatprep.subr.bf16.mxu0 %v310_v13 }
  0x25   :  { %284 = vmatpush3.bf16.msra.mxu0 %v311_v14 }
  0x26   :  { %285 = vmatprep.subr.bf16.mxu0 %v312_v16 }
  0x29   :  { %286 = vmatpush3.bf16.msra.mxu0 %v313_v19 }
  0x2a   :  { %287 = vmatprep.subr.bf16.mxu0 %v314_v21 }
  0x2d   :  { %288 = vmatpush3.bf16.msra.mxu0 %v315_v22 }
  0x2e   :  { %289 = vmatprep.subr.bf16.mxu0 %v316_v23 }
  0x31   :  { %290 = vmatpush3.bf16.msra.mxu0 %v317_v24 }
  0x34   :  { %232 = vmatmul.mubr.bf16.vlgmr.msra.gmra.mrb[0].mxu0 %v93_v25 }
 0x107   :  { %v291_v27 = vpop.f32.mrb[0].mxu0 }
 0x108   :  { %v292_v29 = vpop.f32.mrb[1].mxu0 }
 0x109   :  { %v293_v30 = vadd.f32 %v292_v29, %v291_v27  ;;  %v294_v31 = vpop.f32.mrb[2].mxu0 }
 0x10a   :  { %v295_v32 = vpop.f32.mrb[3].mxu0 }
 0x10b   :  { %v239_v33 = vadd.f32 %v293_v30, %v76_v28 }
 0x10d   :  { %240 = vst [vmem:[#allocation6] sm:$0x3] %v239_v33 }
 0x10e   :  { %351 = shalt.err (!%p348_p12)
}
 0x10f   :  { %s352_s5 = scalar_lea.hbm %s424_s3, 32 }
 0x110   :  { %p353_p13 = scmp.ne.s32.totalorder %s424_s3, %s352_s5  ;;  %p356_p0 = scmp.lt.u32.totalorder %s352_s5, %s424_s3 }
 0x112   :  { %p358_p1 = pnand %p356_p0, %p353_p13 }
 0x114   :  { %361 = shalt.err (!%p358_p1)
}
 0x115   :  { %250 = dma.vmem_to_hbm [thread:$0]  %s248_s29, 32, %s424_s3, [#allocation5]  }
 0x116   :  { %364 = dma.done.wait [#allocation5], 32  }
 0x117   :  { %365 = vsyncadd [#allocation5], 4294967264 }
 0x118   :  { %254 = vsyncpa [#allocation4], 1 }
 0x119   :  { %255 = vsyncpa [#allocation5], 1 }

</bundles_post_ra>
